<compile_context>
chip_gen: v6e
topology: v6e:2x2x1
jax: 0.10.0
libtpu: 0.0.40
codegen_flags: <defaults>
</compile_context>

<pallas_src>
import functools

import jax
import jax.numpy as jnp
from jax import lax
from jax.experimental import pallas as pl
from jax.experimental.pallas import tpu as pltpu

SOBEL_GX = ((-1.0, 0.0, 1.0), (-2.0, 0.0, 2.0), (-1.0, 0.0, 1.0))
SOBEL_GY = ((1.0, 2.0, 1.0), (0.0, 0.0, 0.0), (-1.0, -2.0, -1.0))


def _elu(t):
    # ELU(alpha=1); exp argument clamped so the unselected branch never infs.
    return jnp.where(t > 0.0, t, jnp.exp(jnp.minimum(t, 0.0)) - 1.0)


def _aos_kernel(x_ref, row_ref, rsum_ref, rhead_ref, w_ref, b_ref, o_ref, *, C, W):
    # x_ref:     (bt*C, HW) VMEM  bf16/f32 input tile; rows are batch-major, channel-minor
    # row_ref:   (1, HW)    VMEM  image-row index of each flattened position (f32)
    # rsum_ref:  (bt, bt*C) VMEM  block-diagonal ones  -> per-batch channel sum
    # rhead_ref: (bt, bt*C) VMEM  block-diagonal w[:C] -> per-batch weighted-ELU head
    # w_ref:     (C+1,)     SMEM  1x1 output-conv weights (w[C] multiplies the grads channel)
    # b_ref:     (1,)       SMEM  1x1 output-conv bias
    # o_ref:     (bt, HW)   VMEM  lane- and sublane-dense output tile
    HW = x_ref.shape[-1]

    rowf = row_ref[...]                               # (1, HW)

    # Validity masks for the four neighbour taps, derived by applying the same
    # lane rotation to the row map: a horizontal tap must stay in the same
    # image row, a vertical tap must come from an adjacent row. This
    # re-imposes conv2d(padding=1) zero padding at image borders and at the
    # flat wrap-around, and is independent of the rotate-direction convention
    # (a global flip swaps low/high taps together with their masks, which
    # cancels in grads = gx * gy). Row indices are small ints, exact in f32.
    def _mask(shift, vertical):
        d = pltpu.roll(rowf, shift, 1) - rowf
        ok = (d * d == 1.0) if vertical else (d == 0.0)
        return jnp.where(ok, 1.0, 0.0)

    m_w_lo = _mask(1, False)          # horizontal tap, low side
    m_w_hi = _mask(HW - 1, False)     # horizontal tap, high side
    m_h_lo = _mask(W, True)           # vertical tap, low side
    m_h_hi = _mask(HW - W, True)      # vertical tap, high side
    # Shifts of HW-1 / HW-W are modular rotations equivalent to -1 / -W; the
    # XLU rotate cost is amount-independent.

    def _tap(a, shift, mask):         # masked neighbour value (XLU lane rotation)
        return mask * pltpu.roll(a, shift, 1)

    # Single full-block load + upcast; all further math is f32 on VPU/EUP/XLU.
    xf = x_ref[...].astype(jnp.float32)               # (bt*C, HW)

    # Grouped per-batch channel reductions on the (otherwise idle) MXU:
    #   s   = sum_c x[b, c]            (conv(x, repeat(K, C)) == conv(sum_c x_c, K))
    #   acc = sum_c w[c] * ELU(x[b, c]) (input-channel part of the 1x1-conv head)
    s = jnp.dot(rsum_ref[...], xf, preferred_element_type=jnp.float32)            # (bt, HW)
    acc = jnp.dot(rhead_ref[...], _elu(xf), preferred_element_type=jnp.float32)   # (bt, HW)

    # Separable Sobel (cross-correlation, zero padding):
    #   GX = [1,2,1]_h (x) [-1,0,1]_w     GY = [1,0,-1]_h (x) [1,2,1]_w
    w_lo = _tap(s, 1, m_w_lo)          # value at (h, w-1)
    w_hi = _tap(s, HW - 1, m_w_hi)     # value at (h, w+1)
    d_x = w_hi - w_lo                  # [-1, 0, 1] along w
    s_x = w_lo + 2.0 * s + w_hi        # [ 1, 2, 1] along w
    gx = _tap(d_x, W, m_h_lo) + 2.0 * d_x + _tap(d_x, HW - W, m_h_hi)
    gy = _tap(s_x, W, m_h_lo) - _tap(s_x, HW - W, m_h_hi)
    grads = gx * gy

    # TODO(synk): Restormer backbone definition not provided -> identity on
    # concat(x, grads).

    # Output head: ELU -> Conv2d(C+1 -> 1, kernel 1x1) -> ReLU (grads channel + bias).
    acc = acc + w_ref[C] * _elu(grads) + b_ref[0]
    o_ref[...] = jnp.maximum(acc, 0.0)


def _device_info():
    """(tensorcores_per_chip, per-block VMEM budget, scoped-VMEM limit) by generation."""
    kind = ""
    try:
        kind = jax.devices()[0].device_kind.lower()
    except Exception:
        pass
    if "v7" in kind:                        # 64 MiB VMEM per TC, 2 TCs/chip
        return 2, 20 * 1024 * 1024, 48 * 1024 * 1024
    if "v6" in kind:                        # 128 MiB VMEM, 1 TC
        return 1, 28 * 1024 * 1024, 64 * 1024 * 1024
    if "v5 lite" in kind or "v5e" in kind:  # 128 MiB VMEM, 1 TC
        return 1, 24 * 1024 * 1024, 64 * 1024 * 1024
    return 2, 12 * 1024 * 1024, 32 * 1024 * 1024   # unknown: conservative


def _pick_batch_tile(B, C, HW, in_itemsize, n_cores, block_budget):
    """Largest batch tile whose double-buffered in+out blocks (plus f32 temps)
    fit the per-generation budget, leaving >= 1 tile per TensorCore on
    multi-TC chips and keeping output blocks sublane-dense (bt % 8 == 0 or
    bt == B). bt is capped so the grouped-reduce matrices stay tiny."""
    per_b = 2 * (C * HW * in_itemsize + HW * 4) + 10 * HW * 4
    bt = max(1, int(block_budget) // per_b)
    bt = min(bt, 128)                      # keeps R (bt, bt*C) <= ~256 KiB
    if n_cores >= 2 and B >= 2:
        bt = min(bt, max(1, B // n_cores))
    if bt >= B:
        return B
    cand = (bt // 8) * 8
    while cand >= 8:
        if B % cand == 0:
            return cand
        cand -= 8
    # TODO(synk): switch to a cdiv grid + masked tail tile for awkward B.
    return B


@jax.jit
def aos_restoration_forward(x, w_out, b_out):
    """x: (B, F, H, W) NCHW, any float dtype (pass bfloat16 to halve HBM reads).
    Returns (B, 1, H, W) float32."""
    B, C, H, W = x.shape
    HW = H * W
    assert H >= 3, "row-adjacency masking assumes at least 3 image rows"

    n_cores, block_budget, vmem_limit = _device_info()
    bt = _pick_batch_tile(B, C, HW, x.dtype.itemsize, n_cores, block_budget)

    x_2d = x.reshape(B * C, HW)                       # contiguous -> free relabel
    w_out = w_out.astype(jnp.float32)
    b_out = b_out.astype(jnp.float32)

    # Image-row index of every flattened lane position (1 KiB, DMA'd once).
    row_idx = (jnp.arange(HW, dtype=jnp.int32) // W).astype(jnp.float32)
    row_idx = row_idx.reshape(1, HW)

    # Block-diagonal grouped-reduction matrices: row b selects the C rows of
    # batch b in the (bt*C, HW) block; r_head carries the 1x1-conv weights.
    r_sum = jnp.repeat(jnp.eye(bt, dtype=jnp.float32), C, axis=1)   # (bt, bt*C)
    r_head = r_sum * jnp.tile(w_out[:C], bt)[None, :]               # (bt, bt*C)

    kernel = functools.partial(_aos_kernel, C=C, W=W)

    out_2d = pl.pallas_call(
        kernel,
        out_shape=jax.ShapeDtypeStruct((B, HW), jnp.float32),
        grid=(B // bt,),
        in_specs=[
            pl.BlockSpec((bt * C, HW), lambda i: (i, 0)),
            pl.BlockSpec((1, HW), lambda i: (0, 0)),
            pl.BlockSpec((bt, bt * C), lambda i: (0, 0)),
            pl.BlockSpec((bt, bt * C), lambda i: (0, 0)),
            pl.BlockSpec(memory_space=pltpu.MemorySpace.SMEM),
            pl.BlockSpec(memory_space=pltpu.MemorySpace.SMEM),
        ],
        out_specs=pl.BlockSpec((bt, HW), lambda i: (i, 0)),
        compiler_params=pltpu.CompilerParams(
            dimension_semantics=("parallel",),
            vmem_limit_bytes=vmem_limit),
    )(x_2d, row_idx, r_sum, r_head, w_out, b_out)

    return out_2d.reshape(B, 1, H, W)


def _reference(x, w_out, b_out):
    """Pure-JAX reference mirroring the PyTorch forward (Restormer = identity)."""
    x = x.astype(jnp.float32)
    F = x.shape[1]
    kgx = jnp.array(SOBEL_GX, jnp.float32).reshape(1, 1, 3, 3)
    kgy = jnp.array(SOBEL_GY, jnp.float32).reshape(1, 1, 3, 3)
    wgx = jnp.tile(kgx, (1, F, 1, 1))
    wgy = jnp.tile(kgy, (1, F, 1, 1))
    dn = lax.conv_dimension_numbers(x.shape, wgx.shape, ("NCHW", "OIHW", "NCHW"))
    gx = lax.conv_general_dilated(x, wgx, (1, 1), ((1, 1), (1, 1)),
                                  dimension_numbers=dn)
    gy = lax.conv_general_dilated(x, wgy, (1, 1), ((1, 1), (1, 1)),
                                  dimension_numbers=dn)
    grads = gx * gy
    inputs = jnp.concatenate([x, grads], axis=1)          # (B, F+1, H, W)
    act = _elu(inputs)
    out = jnp.einsum("bchw,c->bhw", act, w_out)[:, None, :, :] + b_out[0]
    return jnp.maximum(out, 0.0)


if __name__ == "__main__":
    # Config: num_focal_planes=4 -> Restormer in channels = 5; out head 5->1.
    B, F, H, W = 2, 4, 16, 16
    key = jax.random.PRNGKey(0)
    kx, kw, kb = jax.random.split(key, 3)

    x = jax.random.normal(kx, (B, F, H, W), dtype=jnp.float32)
    # Deterministic init of the nn.Conv2d(F+1, 1, kernel_size=1) params.
    w_out = jax.random.normal(kw, (F + 1,), dtype=jnp.float32) * 0.1
    b_out = jax.random.normal(kb, (1,), dtype=jnp.float32) * 0.1

    # bf16 input DMA (perf): quantize once here; the reference is fed the same
    # quantized values so the comparison checks the kernel arithmetic only.
    x_bf16 = x.astype(jnp.bfloat16)

    out = aos_restoration_forward(x_bf16, w_out, b_out)
    out = jax.block_until_ready(out)

    ref = _reference(x_bf16.astype(jnp.float32), w_out, b_out)
    assert out.shape == (B, 1, H, W)
    assert jnp.allclose(out, ref, atol=2e-3, rtol=2e-3), "mismatch vs reference"

    print("KERNEL_OK")
</pallas_src>

<mosaic_0001>
module attributes {stable_mosaic.version = 11 : i64} {
  func.func @_aos_kernel(%arg0: i32, %arg1: memref<8x256xbf16, #tpu.memory_space<vmem>>, %arg2: memref<1x256xf32, #tpu.memory_space<vmem>>, %arg3: memref<2x8xf32, #tpu.memory_space<vmem>>, %arg4: memref<2x8xf32, #tpu.memory_space<vmem>>, %arg5: memref<5xf32, #tpu.memory_space<smem>>, %arg6: memref<1xf32, #tpu.memory_space<smem>>, %arg7: memref<2x256xf32, #tpu.memory_space<vmem>>) attributes {dimension_semantics = [#tpu.dimension_semantics<parallel>], iteration_bounds = array<i64: 1>, scalar_prefetch = 0 : i64, scratch_operands = 0 : i64, tpu.core_type = #tpu.core_type<tc>, window_params = [{transform_indices = @transform_0, window_bounds = array<i64: 8, 256>}, {pipeline_mode = #tpu.pipeline_mode<synchronous>, transform_indices = @transform_1, window_bounds = array<i64: 1, 256>}, {pipeline_mode = #tpu.pipeline_mode<synchronous>, transform_indices = @transform_2, window_bounds = array<i64: 2, 8>}, {pipeline_mode = #tpu.pipeline_mode<synchronous>, transform_indices = @transform_3, window_bounds = array<i64: 2, 8>}, {transform_indices = @transform_4, window_bounds = array<i64: 5>}, {transform_indices = @transform_5, window_bounds = array<i64: 1>}, {transform_indices = @transform_6, window_bounds = array<i64: 2, 256>}]} {
    %c0 = arith.constant 0 : index
    %c0_0 = arith.constant 0 : index
    %0 = vector.load %arg2[%c0, %c0_0] : memref<1x256xf32, #tpu.memory_space<vmem>>, vector<1x256xf32>
    %c1_i32 = arith.constant 1 : i32
    %1 = tpu.dynamic_rotate %0 by %c1_i32 dim 1 : vector<1x256xf32>, i32 -> vector<1x256xf32>
    %2 = arith.subf %1, %0 : vector<1x256xf32>
    %cst = arith.constant 0.000000e+00 : f32
    %3 = vector.broadcast %cst : f32 to vector<1x256xf32>
    %4 = arith.cmpf oeq, %2, %3 : vector<1x256xf32>
    %cst_1 = arith.constant 1.000000e+00 : f32
    %cst_2 = arith.constant 0.000000e+00 : f32
    %5 = vector.broadcast %cst_1 : f32 to vector<1x256xf32>
    %6 = vector.broadcast %cst_2 : f32 to vector<1x256xf32>
    %7 = arith.select %4, %5, %6 : vector<1x256xi1>, vector<1x256xf32>
    %c255_i32 = arith.constant 255 : i32
    %8 = tpu.dynamic_rotate %0 by %c255_i32 dim 1 : vector<1x256xf32>, i32 -> vector<1x256xf32>
    %9 = arith.subf %8, %0 : vector<1x256xf32>
    %cst_3 = arith.constant 0.000000e+00 : f32
    %10 = vector.broadcast %cst_3 : f32 to vector<1x256xf32>
    %11 = arith.cmpf oeq, %9, %10 : vector<1x256xf32>
    %cst_4 = arith.constant 1.000000e+00 : f32
    %cst_5 = arith.constant 0.000000e+00 : f32
    %12 = vector.broadcast %cst_4 : f32 to vector<1x256xf32>
    %13 = vector.broadcast %cst_5 : f32 to vector<1x256xf32>
    %14 = arith.select %11, %12, %13 : vector<1x256xi1>, vector<1x256xf32>
    %c16_i32 = arith.constant 16 : i32
    %15 = tpu.dynamic_rotate %0 by %c16_i32 dim 1 : vector<1x256xf32>, i32 -> vector<1x256xf32>
    %16 = arith.subf %15, %0 : vector<1x256xf32>
    %17 = arith.mulf %16, %16 : vector<1x256xf32>
    %cst_6 = arith.constant 1.000000e+00 : f32
    %18 = vector.broadcast %cst_6 : f32 to vector<1x256xf32>
    %19 = arith.cmpf oeq, %17, %18 : vector<1x256xf32>
    %cst_7 = arith.constant 1.000000e+00 : f32
    %cst_8 = arith.constant 0.000000e+00 : f32
    %20 = vector.broadcast %cst_7 : f32 to vector<1x256xf32>
    %21 = vector.broadcast %cst_8 : f32 to vector<1x256xf32>
    %22 = arith.select %19, %20, %21 : vector<1x256xi1>, vector<1x256xf32>
    %c240_i32 = arith.constant 240 : i32
    %23 = tpu.dynamic_rotate %0 by %c240_i32 dim 1 : vector<1x256xf32>, i32 -> vector<1x256xf32>
    %24 = arith.subf %23, %0 : vector<1x256xf32>
    %25 = arith.mulf %24, %24 : vector<1x256xf32>
    %cst_9 = arith.constant 1.000000e+00 : f32
    %26 = vector.broadcast %cst_9 : f32 to vector<1x256xf32>
    %27 = arith.cmpf oeq, %25, %26 : vector<1x256xf32>
    %cst_10 = arith.constant 1.000000e+00 : f32
    %cst_11 = arith.constant 0.000000e+00 : f32
    %28 = vector.broadcast %cst_10 : f32 to vector<1x256xf32>
    %29 = vector.broadcast %cst_11 : f32 to vector<1x256xf32>
    %30 = arith.select %27, %28, %29 : vector<1x256xi1>, vector<1x256xf32>
    %c0_12 = arith.constant 0 : index
    %c0_13 = arith.constant 0 : index
    %31 = vector.load %arg1[%c0_12, %c0_13] : memref<8x256xbf16, #tpu.memory_space<vmem>>, vector<8x256xbf16>
    %32 = arith.extf %31 : vector<8x256xbf16> to vector<8x256xf32>
    %c0_14 = arith.constant 0 : index
    %c0_15 = arith.constant 0 : index
    %33 = vector.load %arg3[%c0_14, %c0_15] : memref<2x8xf32, #tpu.memory_space<vmem>>, vector<2x8xf32>
    %cst_16 = arith.constant dense<0.000000e+00> : vector<2x256xf32>
    %34 = tpu.matmul %33, %32, %cst_16 {dimension_numbers = #tpu.dot_dimension_numbers<[1], [0], [0], [1], [0, 0, 1, 1], [], []>} : vector<2x8xf32>, vector<8x256xf32>, vector<2x256xf32> -> vector<2x256xf32>
    %c0_17 = arith.constant 0 : index
    %c0_18 = arith.constant 0 : index
    %35 = vector.load %arg4[%c0_17, %c0_18] : memref<2x8xf32, #tpu.memory_space<vmem>>, vector<2x8xf32>
    %cst_19 = arith.constant 0.000000e+00 : f32
    %36 = vector.broadcast %cst_19 : f32 to vector<8x256xf32>
    %37 = arith.cmpf ogt, %32, %36 : vector<8x256xf32>
    %cst_20 = arith.constant 0.000000e+00 : f32
    %38 = vector.broadcast %cst_20 : f32 to vector<8x256xf32>
    %39 = arith.minimumf %32, %38 : vector<8x256xf32>
    %40 = math.exp %39 : vector<8x256xf32>
    %cst_21 = arith.constant 1.000000e+00 : f32
    %41 = vector.broadcast %cst_21 : f32 to vector<8x256xf32>
    %42 = arith.subf %40, %41 : vector<8x256xf32>
    %43 = arith.select %37, %32, %42 : vector<8x256xi1>, vector<8x256xf32>
    %cst_22 = arith.constant dense<0.000000e+00> : vector<2x256xf32>
    %44 = tpu.matmul %35, %43, %cst_22 {dimension_numbers = #tpu.dot_dimension_numbers<[1], [0], [0], [1], [0, 0, 1, 1], [], []>} : vector<2x8xf32>, vector<8x256xf32>, vector<2x256xf32> -> vector<2x256xf32>
    %c1_i32_23 = arith.constant 1 : i32
    %45 = tpu.dynamic_rotate %34 by %c1_i32_23 dim 1 : vector<2x256xf32>, i32 -> vector<2x256xf32>
    %46 = vector.broadcast %7 : vector<1x256xf32> to vector<2x256xf32>
    %47 = arith.mulf %46, %45 : vector<2x256xf32>
    %c255_i32_24 = arith.constant 255 : i32
    %48 = tpu.dynamic_rotate %34 by %c255_i32_24 dim 1 : vector<2x256xf32>, i32 -> vector<2x256xf32>
    %49 = vector.broadcast %14 : vector<1x256xf32> to vector<2x256xf32>
    %50 = arith.mulf %49, %48 : vector<2x256xf32>
    %51 = arith.subf %50, %47 : vector<2x256xf32>
    %cst_25 = arith.constant 2.000000e+00 : f32
    %52 = vector.broadcast %cst_25 : f32 to vector<2x256xf32>
    %53 = arith.mulf %52, %34 : vector<2x256xf32>
    %54 = arith.addf %47, %53 : vector<2x256xf32>
    %55 = arith.addf %54, %50 : vector<2x256xf32>
    %c16_i32_26 = arith.constant 16 : i32
    %56 = tpu.dynamic_rotate %51 by %c16_i32_26 dim 1 : vector<2x256xf32>, i32 -> vector<2x256xf32>
    %57 = vector.broadcast %22 : vector<1x256xf32> to vector<2x256xf32>
    %58 = arith.mulf %57, %56 : vector<2x256xf32>
    %cst_27 = arith.constant 2.000000e+00 : f32
    %59 = vector.broadcast %cst_27 : f32 to vector<2x256xf32>
    %60 = arith.mulf %59, %51 : vector<2x256xf32>
    %61 = arith.addf %58, %60 : vector<2x256xf32>
    %c240_i32_28 = arith.constant 240 : i32
    %62 = tpu.dynamic_rotate %51 by %c240_i32_28 dim 1 : vector<2x256xf32>, i32 -> vector<2x256xf32>
    %63 = vector.broadcast %30 : vector<1x256xf32> to vector<2x256xf32>
    %64 = arith.mulf %63, %62 : vector<2x256xf32>
    %65 = arith.addf %61, %64 : vector<2x256xf32>
    %c16_i32_29 = arith.constant 16 : i32
    %66 = tpu.dynamic_rotate %55 by %c16_i32_29 dim 1 : vector<2x256xf32>, i32 -> vector<2x256xf32>
    %67 = vector.broadcast %22 : vector<1x256xf32> to vector<2x256xf32>
    %68 = arith.mulf %67, %66 : vector<2x256xf32>
    %c240_i32_30 = arith.constant 240 : i32
    %69 = tpu.dynamic_rotate %55 by %c240_i32_30 dim 1 : vector<2x256xf32>, i32 -> vector<2x256xf32>
    %70 = vector.broadcast %30 : vector<1x256xf32> to vector<2x256xf32>
    %71 = arith.mulf %70, %69 : vector<2x256xf32>
    %72 = arith.subf %68, %71 : vector<2x256xf32>
    %73 = arith.mulf %65, %72 : vector<2x256xf32>
    %c4 = arith.constant 4 : index
    %74 = memref.load %arg5[%c4] : memref<5xf32, #tpu.memory_space<smem>>
    %cst_31 = arith.constant 0.000000e+00 : f32
    %75 = vector.broadcast %cst_31 : f32 to vector<2x256xf32>
    %76 = arith.cmpf ogt, %73, %75 : vector<2x256xf32>
    %cst_32 = arith.constant 0.000000e+00 : f32
    %77 = vector.broadcast %cst_32 : f32 to vector<2x256xf32>
    %78 = arith.minimumf %73, %77 : vector<2x256xf32>
    %79 = math.exp %78 : vector<2x256xf32>
    %cst_33 = arith.constant 1.000000e+00 : f32
    %80 = vector.broadcast %cst_33 : f32 to vector<2x256xf32>
    %81 = arith.subf %79, %80 : vector<2x256xf32>
    %82 = arith.select %76, %73, %81 : vector<2x256xi1>, vector<2x256xf32>
    %83 = vector.broadcast %74 : f32 to vector<2x256xf32>
    %84 = arith.mulf %83, %82 : vector<2x256xf32>
    %85 = arith.addf %44, %84 : vector<2x256xf32>
    %c0_34 = arith.constant 0 : index
    %86 = memref.load %arg6[%c0_34] : memref<1xf32, #tpu.memory_space<smem>>
    %87 = vector.broadcast %86 : f32 to vector<2x256xf32>
    %88 = arith.addf %85, %87 : vector<2x256xf32>
    %cst_35 = arith.constant 0.000000e+00 : f32
    %89 = vector.broadcast %cst_35 : f32 to vector<2x256xf32>
    %90 = arith.maximumf %88, %89 : vector<2x256xf32>
    %c0_36 = arith.constant 0 : index
    %c0_37 = arith.constant 0 : index
    %91 = vector.load %arg7[%c0_36, %c0_37] : memref<2x256xf32, #tpu.memory_space<vmem>>, vector<2x256xf32>
    tpu.vector_store %arg7[%c0_36, %c0_37], %90 {strides = array<i32>} : memref<2x256xf32, #tpu.memory_space<vmem>>, vector<2x256xf32>,
    return
  }
  func.func @transform_0(%arg0: i32) -> (i32, i32) {
    %c0_i32 = arith.constant 0 : i32
    %c0_i32_0 = arith.constant 0 : i32
    return %arg0, %c0_i32 : i32, i32
  }
  func.func @transform_1(%arg0: i32) -> (i32, i32) {
    %c0_i32 = arith.constant 0 : i32
    %c0_i32_0 = arith.constant 0 : i32
    %c0_i32_1 = arith.constant 0 : i32
    return %c0_i32, %c0_i32_0 : i32, i32
  }
  func.func @transform_2(%arg0: i32) -> (i32, i32) {
    %c0_i32 = arith.constant 0 : i32
    %c0_i32_0 = arith.constant 0 : i32
    %c0_i32_1 = arith.constant 0 : i32
    return %c0_i32, %c0_i32_0 : i32, i32
  }
  func.func @transform_3(%arg0: i32) -> (i32, i32) {
    %c0_i32 = arith.constant 0 : i32
    %c0_i32_0 = arith.constant 0 : i32
    %c0_i32_1 = arith.constant 0 : i32
    return %c0_i32, %c0_i32_0 : i32, i32
  }
  func.func @transform_4(%arg0: i32) -> i32 {
    %c0_i32 = arith.constant 0 : i32
    %c0_i32_0 = arith.constant 0 : i32
    return %c0_i32 : i32
  }
  func.func @transform_5(%arg0: i32) -> i32 {
    %c0_i32 = arith.constant 0 : i32
    %c0_i32_0 = arith.constant 0 : i32
    return %c0_i32 : i32
  }
  func.func @transform_6(%arg0: i32) -> (i32, i32) {
    %c0_i32 = arith.constant 0 : i32
    %c0_i32_0 = arith.constant 0 : i32
    return %arg0, %c0_i32 : i32, i32
  }
}

</mosaic_0001>

<bundles_post_ra>
// kernel: tile.8
= control target key start
LH: loop header
LB: loop body
LE: loop exit
PB: predicated region body
PF: predicated region fallthrough
CT: control target
= control target key end

     0   :  { %s22_s0 = inlined_call_operand.vmem [shape: f32[4], index: 0, kind: input, shape index: {}]   ;;  %s23_s1 = inlined_call_operand.vmem [shape: f32[2,4], index: 1, kind: output, shape index: {}]  }
   0x1   :  { %v4_v0 = vld [vmem:[%s22_s0] ss:$0 sm:$0xff] }
   0x2   :  { %5 = vst [vmem:[%s23_s1] sm:$0x3] %v4_v0 }

// kernel: mul.5
= control target key start
LH: loop header
LB: loop body
LE: loop exit
PB: predicated region body
PF: predicated region fallthrough
CT: control target
= control target key end

     0   :  { %vm8_vm0 = vcmask 31744   ;;  %vm14_vm1 = vcmask 64544   ;;  %s42_s0 = inlined_call_operand.vmem [shape: f32[2,4], index: 0, kind: input, shape index: {}]   ;;  %s43_s1 = inlined_call_operand.vmem [shape: f32[8], index: 1, kind: output, shape index: {}]  }
   0x1   :  { %v5_v0 = vld [vmem:[%s42_s0] sm:$0x3]  ;;  %s25_s0 = smov 4  }
   0x2   :  { %6 = vst [vmem:[#allocation1] sm:$0x3] %v5_v0 }
   0x9   :  { %v11_v1 = vld [vmem:[#allocation1 + $0x1] sm:$0x1]   ;;  %v7_v2 = vld [vmem:[#allocation1] sm:$0x1]  }
   0xa   :  { %12 = vrot.lane.b32.xlu0 %v11_v1, %s25_s0  ;;  %9 = vst.msk [vmem:[#allocation0] sm:$0x1] %vm8_vm0, %v7_v2  }
  0x7c   :  { %v13_v3 = vpop.permute.xlu0 %12  }
  0x7d   :  { %15 = vst.msk [vmem:[#allocation0] sm:$0x1] %vm14_vm1, %v13_v3  }
  0x84   :  { %v20_v4 = vld [vmem:[#allocation0] sm:$0x1] }
  0x85   :  { %23 = vst [vmem:[%s43_s1] sm:$0x1] %v20_v4 }

// kernel: aos_restoration_forward.1
= control target key start
LH: loop header
LB: loop body
LE: loop exit
PB: predicated region body
PF: predicated region fallthrough
CT: control target
= control target key end

     0   :  { %12 = vsyncpa [#allocation4], 0  ;;  %s609_s0 = inlined_call_operand.vmem [shape: bf16[8,256], index: 0, kind: input, shape index: {}]   ;;  %s610_s1 = inlined_call_operand.vmem [shape: f32[1,256], index: 1, kind: input, shape index: {}]   ;;  %s611_s2 = inlined_call_operand.vmem [shape: f32[2,8], index: 2, kind: input, shape index: {}]   ;;  %s612_s3 = inlined_call_operand.vmem [shape: f32[2,8], index: 3, kind: input, shape index: {}]   ;;  %s613_s4 = inlined_call_operand.vmem [shape: f32[5], index: 4, kind: input, shape index: {}]   ;;  %s614_s5 = inlined_call_operand.<no memory space> [shape: f32[1], index: 5, kind: input, shape index: {}]   ;;  %s615_s6 = inlined_call_operand.vmem [shape: f32[2,256], index: 6, kind: output, shape index: {}]  }
   0x1   :  { %s27_s23 = sshll.u32 %s613_s4, 4  ;;  %s28_s23 = int_to_ptr.vmem [resolvable:$true] %s27_s23 }
   0x2   :  { %s432_s24 = scalar_lea.vmem %s28_s23, 16  ;;  %p437_p1 = scmp.lt.s32.totalorder %s28_s23, %s28_s23 }
   0x3   :  { %p433_p0 = scmp.ne.s32.totalorder %s28_s23, %s432_s24  ;;  %p438_p2 = scmp.lt.s32.totalorder %s432_s24, %s432_s24 }
   0x5   :  { %p439_p3 = por %p438_p2, %p437_p1 }
   0x7   :  { %p440_p4 = pnand %p439_p3, %p433_p0 }
   0x9   :  { %443 = shalt.err (!%p440_p4)
}
   0xa   :  { %s446_s25 = smov [#allocation3]  }
   0xb   :  { %30 = dma.vmem_to_smem %s28_s23, 16, %s446_s25, [#allocation4]  }
   0xc   :  { %444 = dma.done.wait [#allocation4], 16  }
   0xd   :  { %445 = vsyncadd [#allocation4], 4294967280 }
   0xe   :  { %36 = sfence }
   0xf   :  { %v107_v0 = vld [vmem:[%s609_s0] sm:$0xff]  ;;  %v39_v1 = vlaneseq  ;;  %v447_v4 = vmov 0.0   ;;  %vm111_vm0 = vcmask 64512   ;;  %s448_s0 = smov 127   ;;  %s450_s8 = smov 16  }
  0x10   :  { %v109_v2 = vunpack.c.h.bf16 %v107_v0  ;;  %v108_v3 = vunpack.c.l.bf16 %v107_v0  ;;  %179 = vmatprep.mubr.f32.mxu0 %v447_v4  ;;  %380 = vmatprep.mubr.f32.mxu1 %v447_v4  ;;  %v110_v5 = vld [vmem:[%s611_s2] sm:$0x3]  ;;  %s449_s2 = smov 1   ;;  %s451_s9 = smov 112  }
  0x11   :  { %v40_v6 = vshrl.u32 %v39_v1, 7  ;;  %v37_v7 = vld [vmem:[%s610_s1] sm:$0x3]  ;;  %v525_v27 = vand.u32 127, %v39_v1 }
  0x12   :  { %145 = vmatprep.subr.mxu0 %v109_v2  ;;  %v190_v12 = vmin.f32 %v109_v2, 0.0  ;;  %v189_v13 = vmin.f32 %v108_v3, 0.0  ;;  %vm188_vm1 = vcmp.gt.f32.partialorder %v109_v2, 0.0  ;;  %vm187_vm2 = vcmp.gt.f32.partialorder %v108_v3, 0.0  ;;  %v186_v21 = vld [vmem:[%s612_s3] sm:$0x3] }
  0x13   :  { %146 = vmatpush1.msra.mxu0 %v108_v3  ;;  %v501_v8 = vsub.s32 0, %v40_v6  ;;  %v45_v9 = vsub.s32 1, %v40_v6  ;;  %vm68_vm3 = vcmp.lt.s32.totalorder %v525_v27, 127  ;;  %vm55_vm4 = vcmp.lt.s32.totalorder %v525_v27, 1  ;;  %s413_s3 = sld [smem:[#allocation3 + $0x4]] }
  0x14   :  { %410 = vmatmul.mubr.msk.f32.vlgmr.msra.gmra.mxu0 %vm111_vm0, %v110_v5  ;;  %v193_v14 = vmul.f32 1.442695, %v190_v12  ;;  %v191_v15 = vmul.f32 1.442695, %v189_v13  ;;  %vm81_vm9 = vcmp.lt.s32.totalorder %v525_v27, 16  ;;  %vm96_vm10 = vcmp.lt.s32.totalorder %v525_v27, 112 }
  0x15   :  { %v505_v10 = vrot.slane %v37_v7, %v501_v8  ;;  %v509_v11 = vrot.slane %v37_v7, %v45_v9 }
  0x16   :  { %424 = vpow2.f32 %v193_v14 }
  0x17   :  { %64 = vrot.lane.b32.xlu1 %v505_v10, %s448_s0  ;;  %49 = vrot.lane.b32.xlu0 %v505_v10, %s449_s2  ;;  %426 = vpow2.f32 %v191_v15 }
  0x1b   :  { %66 = vrot.lane.b32.xlu1 %v509_v11, %s448_s0  ;;  %51 = vrot.lane.b32.xlu0 %v509_v11, %s449_s2 }
  0x23   :  { %v425_v16 = vpop.eup %424 }
  0x24   :  { %v427_v17 = vpop.eup %426  ;;  %v412_v18 = vadd.f32 -1.0, %v425_v16 }
  0x25   :  { %v411_v19 = vadd.f32 -1.0, %v427_v17 }
  0x26   :  { %v198_v20 = vsel %vm188_vm1, %v109_v2, %v412_v18 }
  0x27   :  { %346 = vmatprep.subr.mxu1 %v198_v20  ;;  %v197_v22 = vsel %vm187_vm2, %v108_v3, %v411_v19 }
  0x28   :  { %347 = vmatpush1.msra.mxu1 %v197_v22 }
  0x29   :  { %416 = vmatmul.mubr.msk.f32.vlgmr.msra.gmra.mxu1 %vm111_vm0, %v186_v21 }
  0x89   :  { %v65_v25 = vpop.permute.xlu1 %64  ;;  %v50_v26 = vpop.permute.xlu0 %49 }
  0x8d   :  { %v67_v28 = vpop.permute.xlu1 %66  ;;  %v52_v29 = vpop.permute.xlu0 %51 }
  0x8e   :  { %v69_v30 = vsel %vm68_vm3, %v65_v25, %v67_v28  ;;  %v70_v31 = vsel %vm68_vm3, %v67_v28, %v65_v25  ;;  %v56_v32 = vsel %vm55_vm4, %v50_v26, %v52_v29  ;;  %v57_v33 = vsel %vm55_vm4, %v52_v29, %v50_v26 }
  0x8f   :  { %v71_v34 = vsub.f32 %v69_v30, %v505_v10  ;;  %v72_v35 = vsub.f32 %v70_v31, %v509_v11  ;;  %v58_v36 = vsub.f32 %v57_v33, %v505_v10  ;;  %v59_v37 = vsub.f32 %v56_v32, %v509_v11 }
  0x91   :  { %vm73_vm5 = vcmp.eq.f32.partialorder %v71_v34, 0.0  ;;  %vm74_vm6 = vcmp.eq.f32.partialorder %v72_v35, 0.0  ;;  %vm60_vm7 = vcmp.eq.f32.partialorder %v58_v36, 0.0  ;;  %vm61_vm8 = vcmp.eq.f32.partialorder %v59_v37, 0.0 }
  0x92   :  { %v75_v40 = vsel %vm73_vm5, 1.0, %v447_v4  ;;  %v76_v41 = vsel %vm74_vm6, 1.0, %v447_v4  ;;  %v62_v42 = vsel %vm60_vm7, 1.0, %v447_v4  ;;  %v63_v43 = vsel %vm61_vm8, 1.0, %v447_v4 }
  0x93   :  { %v208_v46 = vrot.slane %v62_v42, %v501_v8  ;;  %v212_v47 = vrot.slane %v63_v43, %v501_v8  ;;  %v224_v49 = vrot.slane %v75_v40, %v501_v8  ;;  %v228_v50 = vrot.slane %v76_v41, %v501_v8 }
  0xd4   :  { %v181_v23 = vpop.f32.mrf.mxu0 }
  0xd5   :  { %199 = vrot.lane.b32.xlu0 %v181_v23, %s449_s2  ;;  %v233_v60 = vmul.f32 2.0, %v181_v23 }
  0xd6   :  { %v183_v24 = vpop.f32.mrf.mxu0 }
  0xd7   :  { %201 = vrot.lane.b32.xlu1 %v183_v24, %s449_s2  ;;  %v234_v61 = vmul.f32 2.0, %v183_v24 }
  0xd9   :  { %215 = vrot.lane.b32.xlu0 %v181_v23, %s448_s0 }
  0xdb   :  { %217 = vrot.lane.b32.xlu1 %v183_v24, %s448_s0 }
  0xdd   :  { %77 = vrot.lane.b32.xlu0 %v505_v10, %s450_s8 }
  0xdf   :  { %79 = vrot.lane.b32.xlu1 %v509_v11, %s450_s8 }
  0xe1   :  { %92 = vrot.lane.b32.xlu0 %v505_v10, %s451_s9 }
  0xe3   :  { %94 = vrot.lane.b32.xlu1 %v509_v11, %s451_s9 }
 0x147   :  { %v200_v38 = vpop.permute.xlu0 %199 }
 0x149   :  { %v202_v39 = vpop.permute.xlu1 %201 }
 0x14a   :  { %v203_v44 = vsel %vm55_vm4, %v200_v38, %v202_v39  ;;  %v204_v45 = vsel %vm55_vm4, %v202_v39, %v200_v38 }
 0x14b   :  { %v216_v48 = vpop.permute.xlu0 %215  ;;  %v213_v54 = vmul.f32 %v208_v46, %v204_v45  ;;  %v214_v55 = vmul.f32 %v212_v47, %v203_v44 }
 0x14d   :  { %v218_v51 = vpop.permute.xlu1 %217  ;;  %v235_v62 = vadd.f32 %v233_v60, %v213_v54  ;;  %v236_v63 = vadd.f32 %v234_v61, %v214_v55 }
 0x14e   :  { %v219_v52 = vsel %vm68_vm3, %v216_v48, %v218_v51  ;;  %v220_v53 = vsel %vm68_vm3, %v218_v51, %v216_v48 }
 0x14f   :  { %v229_v56 = vmul.f32 %v224_v49, %v219_v52  ;;  %v230_v57 = vmul.f32 %v228_v50, %v220_v53  ;;  %v78_v3 = vpop.permute.xlu0 %77 }
 0x151   :  { %v232_v58 = vsub.f32 %v230_v57, %v214_v55  ;;  %v231_v59 = vsub.f32 %v229_v56, %v213_v54  ;;  %v238_v0 = vadd.f32 %v236_v63, %v230_v57  ;;  %v237_v1 = vadd.f32 %v235_v62, %v229_v56  ;;  %v80_v2 = vpop.permute.xlu1 %79 }
 0x152   :  { %v82_v5 = vsel %vm81_vm9, %v78_v3, %v80_v2  ;;  %v83_v6 = vsel %vm81_vm9, %v80_v2, %v78_v3  ;;  %v310_v3 = vstv %s413_s3 }
 0x153   :  { %241 = vrot.lane.b32.xlu1 %v232_v58, %s450_s8  ;;  %239 = vrot.lane.b32.xlu0 %v231_v59, %s450_s8  ;;  %v93_v9 = vpop.permute.xlu0 %92  ;;  %v84_v12 = vsub.f32 %v83_v6, %v505_v10  ;;  %v85_v13 = vsub.f32 %v82_v5, %v509_v11  ;;  %v255_v40 = vmul.f32 2.0, %v231_v59  ;;  %v256_v41 = vmul.f32 2.0, %v232_v58  ;;  %v382_v5 = vpop.f32.mrf.mxu1 }
 0x155   :  { %v95_v7 = vpop.permute.xlu1 %94  ;;  %v86_v18 = vmul.f32 %v84_v12, %v84_v12  ;;  %v87_v19 = vmul.f32 %v85_v13, %v85_v13  ;;  %v388_v13 = vstv %s614_s5 }
 0x156   :  { %v97_v14 = vsel %vm96_vm10, %v93_v9, %v95_v7  ;;  %v98_v15 = vsel %vm96_vm10, %v95_v7, %v93_v9 }
 0x157   :  { %261 = vrot.lane.b32.xlu1 %v232_v58, %s451_s9  ;;  %259 = vrot.lane.b32.xlu0 %v231_v59, %s451_s9  ;;  %v99_v16 = vsub.f32 %v97_v14, %v505_v10  ;;  %v100_v17 = vsub.f32 %v98_v15, %v509_v11  ;;  %vm88_vm11 = vcmp.eq.f32.partialorder %v86_v18, 1.0  ;;  %vm89_vm12 = vcmp.eq.f32.partialorder %v87_v19, 1.0 }
 0x158   :  { %v90_v24 = vsel %vm88_vm11, 1.0, %v447_v4  ;;  %v91_v25 = vsel %vm89_vm12, 1.0, %v447_v4 }
 0x159   :  { %v101_v20 = vmul.f32 %v99_v16, %v99_v16  ;;  %v102_v21 = vmul.f32 %v100_v17, %v100_v17  ;;  %v248_v29 = vrot.slane %v90_v24, %v501_v8  ;;  %v252_v30 = vrot.slane %v91_v25, %v501_v8  ;;  %v384_v16 = vpop.f32.mrf.mxu1 }
 0x15b   :  { %279 = vrot.lane.b32.xlu1 %v238_v0, %s450_s8  ;;  %277 = vrot.lane.b32.xlu0 %v237_v1, %s450_s8  ;;  %vm103_vm13 = vcmp.eq.f32.partialorder %v101_v20, 1.0  ;;  %vm104_vm14 = vcmp.eq.f32.partialorder %v102_v21, 1.0 }
 0x15c   :  { %v105_v10 = vsel %vm103_vm13, 1.0, %v447_v4  ;;  %v106_v11 = vsel %vm104_vm14, 1.0, %v447_v4 }
 0x15d   :  { %v268_v33 = vrot.slane %v105_v10, %v501_v8  ;;  %v272_v34 = vrot.slane %v106_v11, %v501_v8 }
 0x15f   :  { %287 = vrot.lane.b32.xlu1 %v238_v0, %s451_s9  ;;  %285 = vrot.lane.b32.xlu0 %v237_v1, %s451_s9 }
 0x1c5   :  { %v242_v22 = vpop.permute.xlu1 %241  ;;  %v240_v23 = vpop.permute.xlu0 %239 }
 0x1c6   :  { %v243_v31 = vsel %vm81_vm9, %v240_v23, %v242_v22  ;;  %v244_v32 = vsel %vm81_vm9, %v242_v22, %v240_v23 }
 0x1c7   :  { %v253_v37 = vmul.f32 %v248_v29, %v244_v32  ;;  %v254_v38 = vmul.f32 %v252_v30, %v243_v31 }
 0x1c9   :  { %v262_v26 = vpop.permute.xlu1 %261  ;;  %v260_v28 = vpop.permute.xlu0 %259  ;;  %v257_v47 = vadd.f32 %v255_v40, %v253_v37  ;;  %v258_v48 = vadd.f32 %v256_v41, %v254_v38 }
 0x1ca   :  { %v263_v4 = vsel %vm96_vm10, %v260_v28, %v262_v26  ;;  %v264_v39 = vsel %vm96_vm10, %v262_v26, %v260_v28 }
 0x1cb   :  { %v273_v44 = vmul.f32 %v268_v33, %v263_v4  ;;  %v274_v8 = vmul.f32 %v272_v34, %v264_v39 }
 0x1cd   :  { %v280_v35 = vpop.permute.xlu1 %279  ;;  %v278_v36 = vpop.permute.xlu0 %277  ;;  %v275_v55 = vadd.f32 %v273_v44, %v257_v47  ;;  %v276_v56 = vadd.f32 %v274_v8, %v258_v48 }
 0x1ce   :  { %v281_v42 = vsel %vm81_vm9, %v278_v36, %v280_v35  ;;  %v282_v43 = vsel %vm81_vm9, %v280_v35, %v278_v36 }
 0x1cf   :  { %v283_v51 = vmul.f32 %v282_v43, %v248_v29  ;;  %v284_v52 = vmul.f32 %v281_v42, %v252_v30 }
 0x1d1   :  { %v288_v45 = vpop.permute.xlu1 %287  ;;  %v286_v46 = vpop.permute.xlu0 %285 }
 0x1d2   :  { %v289_v49 = vsel %vm96_vm10, %v286_v46, %v288_v45  ;;  %v290_v50 = vsel %vm96_vm10, %v288_v45, %v286_v46 }
 0x1d3   :  { %v291_v53 = vmul.f32 %v289_v49, %v268_v33  ;;  %v292_v54 = vmul.f32 %v290_v50, %v272_v34 }
 0x1d5   :  { %v293_v57 = vsub.f32 %v283_v51, %v291_v53  ;;  %v294_v58 = vsub.f32 %v284_v52, %v292_v54 }
 0x1d7   :  { %v295_v59 = vmul.f32 %v293_v57, %v275_v55  ;;  %v296_v60 = vmul.f32 %v294_v58, %v276_v56 }
 0x1d9   :  { %v300_v61 = vmin.f32 %v295_v59, 0.0  ;;  %v301_v62 = vmin.f32 %v296_v60, 0.0  ;;  %vm298_vm15 = vcmp.gt.f32.partialorder %v295_v59, 0.0  ;;  %vm299_vm0 = vcmp.gt.f32.partialorder %v296_v60, 0.0 }
 0x1db   :  { %v302_v63 = vmul.f32 1.442695, %v300_v61  ;;  %v304_v0 = vmul.f32 1.442695, %v301_v62 }
 0x1dd   :  { %428 = vpow2.f32 %v302_v63 }
 0x1de   :  { %430 = vpow2.f32 %v304_v0 }
 0x1ea   :  { %v429_v1 = vpop.eup %428 }
 0x1eb   :  { %v431_v27 = vpop.eup %430  ;;  %v414_v2 = vadd.f32 -1.0, %v429_v1 }
 0x1ec   :  { %v415_v6 = vadd.f32 -1.0, %v431_v27 }
 0x1ed   :  { %v308_v7 = vsel %vm298_vm15, %v295_v59, %v414_v2 }
 0x1ee   :  { %v311_v9 = vmul.f32 %v310_v3, %v308_v7  ;;  %v309_v12 = vsel %vm299_vm0, %v296_v60, %v415_v6 }
 0x1ef   :  { %v312_v14 = vmul.f32 %v310_v3, %v309_v12 }
 0x1f0   :  { %v383_v15 = vadd.f32 %v382_v5, %v311_v9 }
 0x1f1   :  { %v385_v17 = vadd.f32 %v384_v16, %v312_v14 }
 0x1f2   :  { %v389_v18 = vadd.f32 %v388_v13, %v383_v15 }
 0x1f3   :  { %v390_v19 = vadd.f32 %v388_v13, %v385_v17 }
 0x1f4   :  { %v391_v20 = vmax.f32 %v389_v18, 0.0 }
 0x1f5   :  { %v392_v21 = vmax.f32 %v390_v19, 0.0 }
 0x1f7   :  { %v395_v22 = vcombine.low %v391_v20, %v392_v21 }
 0x1f9   :  { %417 = vst.sshfl [vmem:[%s615_s6] sm:$0x33 pattern:$0x76325410] %v395_v22 }
 0x1fa   :  { %409 = vsyncpa [#allocation4], 1 }

</bundles_post_ra>
